<compile_context>
chip_gen: v7x
topology: tpu7x:2x2x1
jax: 0.10.0
libtpu: 0.0.40
codegen_flags: <defaults>
</compile_context>

<pallas_src>
import functools

import jax
import jax.numpy as jnp
from jax import lax
from jax.experimental import pallas as pl
from jax.experimental.pallas import tpu as pltpu


def _round_up(x, m):
    return ((x + m - 1) // m) * m


def _budget_sum_kernel(g_ref, out_ref, acc_ref):
    """Accumulate per-channel sums of a (2*TB, HW) block.

    Rows alternate channel 0 / channel 1 (row r -> channel r % 2), so after
    folding rows into groups of 8 sublanes, even sublanes carry channel-0 data
    and odd sublanes carry channel-1 data.
    """
    i = pl.program_id(1)

    @pl.when(i == 0)
    def _():
        acc_ref[...] = jnp.zeros_like(acc_ref)

    g = g_ref[...].astype(jnp.float32)            # (2*TB, HW)
    rows, hw = g.shape
    # (2*TB, HW) -> (2*TB//8, 8, HW): pure regrouping of vreg rows; the sum over
    # the leading axis is elementwise vreg accumulation on the VPU (no XLU).
    acc_ref[...] += jnp.sum(g.reshape(rows // 8, 8, hw), axis=0)

    @pl.when(i == pl.num_programs(1) - 1)
    def _():
        acc = acc_ref[...]                        # (8, HW) f32
        sub = lax.broadcasted_iota(jnp.int32, acc.shape, 0)
        s1 = jnp.sum(jnp.where(sub % 2 == 1, acc, 0.0))   # sum over channel 1
        s_all = jnp.sum(acc)                               # ch0 + ch1
        weighted = s_all + 3.0 * s1                        # = sum(ch0) + 4*sum(ch1)
        # Lane-dense full-tile store; wrapper reads element [s, 0, 0].
        out_ref[...] = jnp.full(out_ref.shape, weighted, dtype=jnp.float32)


def budget_constraint_ratio_mse_dual_grain(
        gate,
        target_ratio=0.0,
        gamma=1.0,
        min_grain_size=8,
        max_grain_size=16,
        calculate_all=True,
        block_bytes=2 * 1024 * 1024):
    """gate: (B, C>=2, H, W); only channels 0 and 1 are used (as in PyTorch)."""
    B, C, H, W = gate.shape
    assert C >= 2
    const = float(min_grain_size) ** 2
    max_const = float(max_grain_size) ** 2 - const
    HW = H * W

    # Drop unused channels before the DMA (pure HBM-bandwidth saving when C>2),
    # then flatten to (B*2, H*W): row r -> (batch r // 2, channel r % 2).
    g = gate[:, :2, :, :].reshape(B * 2, HW)

    # Pick TB (batches per block) so one double-buffered block stays ~2 MiB of
    # VMEM (lane-padded), comfortably inside v5e/v6e/v7x scoped limits.
    itemsize = jnp.dtype(gate.dtype).itemsize
    lane_padded = _round_up(HW, 128)
    vmem_bytes_per_batch = 2 * lane_padded * itemsize
    tb = max(1, block_bytes // vmem_bytes_per_batch)
    tb = min(tb, max(B, 1))
    tb = _round_up(tb, 4)                         # 2*tb rows -> multiple of 8 sublanes

    n_blocks = pl.cdiv(B, tb)
    nsplit = 2 if n_blocks >= 2 else 1            # per-core partial sums (v7x 2 TCs)
    inner = pl.cdiv(n_blocks, nsplit)
    b_pad = nsplit * inner * tb

    rows = 2 * B
    rows_pad = 2 * b_pad
    if rows_pad != rows:
        # Zero padding contributes nothing to the sums; we divide by the true B.
        g = jnp.pad(g, ((0, rows_pad - rows), (0, 0)))

    partials = pl.pallas_call(
        _budget_sum_kernel,
        out_shape=jax.ShapeDtypeStruct((nsplit, 8, 128), jnp.float32),
        grid_spec=pltpu.PrefetchScalarGridSpec(
            num_scalar_prefetch=0,
            grid=(nsplit, inner),
            in_specs=[pl.BlockSpec((2 * tb, HW), lambda s, i: (s * inner + i, 0))],
            out_specs=pl.BlockSpec((1, 8, 128), lambda s, i: (s, 0, 0)),
            scratch_shapes=[pltpu.VMEM((8, HW), jnp.float32)],
        ),
        compiler_params=pltpu.CompilerParams(
            dimension_semantics=("parallel", "arbitrary"),
            vmem_limit_bytes=32 * 1024 * 1024,
        ),
    )(g)

    # Tiny scalar epilogue on the combined partial sums (a handful of flops).
    total = jnp.sum(partials[:, 0, 0])
    beta = total / float(B) - const
    budget_ratio = beta / max_const
    diff = budget_ratio - float(target_ratio)
    loss = float(gamma) * diff * diff
    if calculate_all:
        # (1 - br) - (1 - tr) == -(br - tr)  -> identical squared error
        loss = loss + float(gamma) * diff * diff
    return loss


def _reference(gate, target_ratio=0.0, gamma=1.0,
               min_grain_size=8, max_grain_size=16, calculate_all=True):
    gate = gate.astype(jnp.float32)
    const = min_grain_size ** 2
    max_const = max_grain_size ** 2 - const
    beta = (gate[:, 0] + 4.0 * gate[:, 1]).sum() / gate.shape[0] - const
    budget_ratio = beta / max_const
    loss = gamma * (budget_ratio - target_ratio) ** 2
    if calculate_all:
        loss = loss + gamma * ((1 - budget_ratio) - (1 - target_ratio)) ** 2
    return loss


if __name__ == "__main__":
    key = jax.random.PRNGKey(0)
    k1, k2 = jax.random.split(key)

    # Case 1: canonical small shape (B=2, C=2, 16x16), default blocking.
    gate1 = jax.random.uniform(k1, (2, 2, 16, 16), dtype=jnp.float32)
    out1 = jax.block_until_ready(budget_constraint_ratio_mse_dual_grain(gate1))
    ref1 = _reference(gate1)
    assert jnp.allclose(out1, ref1, rtol=1e-4, atol=1e-5), (out1, ref1)

    # Case 2: C > 2 (extra channels ignored), B not a multiple of the batch
    # tile (exercises zero-padding), and tiny block_bytes to force a
    # multi-block grid plus the 2-way parallel split.
    gate2 = jax.random.uniform(k2, (20, 4, 16, 16), dtype=jnp.float32)
    out2 = jax.block_until_ready(
        budget_constraint_ratio_mse_dual_grain(
            gate2, target_ratio=0.3, gamma=0.5, calculate_all=False,
            block_bytes=2048))
    ref2 = _reference(gate2, target_ratio=0.3, gamma=0.5, calculate_all=False)
    assert jnp.allclose(out2, ref2, rtol=1e-4, atol=1e-5), (out2, ref2)

    print("KERNEL_OK")
</pallas_src>

<mosaic_0001>
module attributes {stable_mosaic.version = 11 : i64} {
  func.func @_budget_sum_kernel(%arg0: i32, %arg1: i32, %arg2: memref<8x256xf32, #tpu.memory_space<vmem>>, %arg3: memref<1x8x128xf32, #tpu.memory_space<vmem>>, %arg4: memref<8x256xf32, #tpu.memory_space<vmem>>) attributes {dimension_semantics = [#tpu.dimension_semantics<parallel>, #tpu.dimension_semantics<arbitrary>], iteration_bounds = array<i64: 1, 1>, scalar_prefetch = 0 : i64, scratch_operands = 1 : i64, tpu.core_type = #tpu.core_type<tc>, window_params = [{transform_indices = @transform_0, window_bounds = array<i64: 8, 256>}, {transform_indices = @transform_1, window_bounds = array<i64: 1, 8, 128>}]} {
    %c0_i32 = arith.constant 0 : i32
    %0 = arith.cmpi eq, %arg1, %c0_i32 : i32
    %1 = arith.extui %0 : i1 to i32
    %c0_i32_0 = arith.constant 0 : i32
    %2 = arith.cmpi ne, %1, %c0_i32_0 : i32
    scf.if %2 {
      %cst_8 = arith.constant 0.000000e+00 : f32
      %12 = vector.broadcast %cst_8 : f32 to vector<8x256xf32>
      %c0_9 = arith.constant 0 : index
      %c0_10 = arith.constant 0 : index
      %13 = vector.load %arg4[%c0_9, %c0_10] : memref<8x256xf32, #tpu.memory_space<vmem>>, vector<8x256xf32>
      tpu.vector_store %arg4[%c0_9, %c0_10], %12 {strides = array<i32>} : memref<8x256xf32, #tpu.memory_space<vmem>>, vector<8x256xf32>,
    } else {
    }
    %c0 = arith.constant 0 : index
    %c0_1 = arith.constant 0 : index
    %3 = vector.load %arg2[%c0, %c0_1] : memref<8x256xf32, #tpu.memory_space<vmem>>, vector<8x256xf32>
    %c0_2 = arith.constant 0 : index
    %c0_3 = arith.constant 0 : index
    %4 = vector.load %arg4[%c0_2, %c0_3] : memref<8x256xf32, #tpu.memory_space<vmem>>, vector<8x256xf32>
    %5 = vector.shape_cast %3 : vector<8x256xf32> to vector<1x8x256xf32>
    %cst = arith.constant dense<0.000000e+00> : vector<8x256xf32>
    %6 = vector.multi_reduction <add>, %5, %cst [0] : vector<1x8x256xf32> to vector<8x256xf32>
    %7 = arith.addf %4, %6 : vector<8x256xf32>
    %c0_4 = arith.constant 0 : index
    %c0_5 = arith.constant 0 : index
    %8 = vector.load %arg4[%c0_4, %c0_5] : memref<8x256xf32, #tpu.memory_space<vmem>>, vector<8x256xf32>
    tpu.vector_store %arg4[%c0_4, %c0_5], %7 {strides = array<i32>} : memref<8x256xf32, #tpu.memory_space<vmem>>, vector<8x256xf32>,
    %c0_i32_6 = arith.constant 0 : i32
    %9 = arith.cmpi eq, %arg1, %c0_i32_6 : i32
    %10 = arith.extui %9 : i1 to i32
    %c0_i32_7 = arith.constant 0 : i32
    %11 = arith.cmpi ne, %10, %c0_i32_7 : i32
    scf.if %11 {
      %c0_8 = arith.constant 0 : index
      %c0_9 = arith.constant 0 : index
      %12 = vector.load %arg4[%c0_8, %c0_9] : memref<8x256xf32, #tpu.memory_space<vmem>>, vector<8x256xf32>
      %13 = tpu.iota {dimensions = array<i32: 0>} : vector<8x256xi32>
      %c2_i32 = arith.constant 2 : i32
      %c0_i32_10 = arith.constant 0 : i32
      %14 = arith.cmpi eq, %c2_i32, %c0_i32_10 : i32
      %c1_i32 = arith.constant 1 : i32
      %15 = arith.select %14, %c1_i32, %c2_i32 : i32
      %16 = vector.broadcast %15 : i32 to vector<8x256xi32>
      %17 = arith.remsi %13, %16 : vector<8x256xi32>
      %c0_i32_11 = arith.constant 0 : i32
      %18 = vector.broadcast %c0_i32_11 : i32 to vector<8x256xi32>
      %19 = arith.cmpi ne, %17, %18 : vector<8x256xi32>
      %c0_i32_12 = arith.constant 0 : i32
      %20 = vector.broadcast %c0_i32_12 : i32 to vector<8x256xi32>
      %21 = arith.cmpi slt, %17, %20 : vector<8x256xi32>
      %c0_i32_13 = arith.constant 0 : i32
      %22 = arith.cmpi slt, %15, %c0_i32_13 : i32
      %23 = vector.broadcast %22 : i1 to vector<8x256xi1>
      %24 = vector.broadcast %23 : vector<8x256xi1> to vector<8x256xi1>
      %25 = arith.xori %21, %24 : vector<8x256xi1>
      %26 = arith.andi %25, %19 : vector<8x256xi1>
      %27 = vector.broadcast %15 : i32 to vector<8x256xi32>
      %28 = arith.addi %17, %27 : vector<8x256xi32>
      %29 = arith.select %26, %28, %17 : vector<8x256xi1>, vector<8x256xi32>
      %c1_i32_14 = arith.constant 1 : i32
      %30 = vector.broadcast %c1_i32_14 : i32 to vector<8x256xi32>
      %31 = arith.cmpi eq, %29, %30 : vector<8x256xi32>
      %cst_15 = arith.constant 0.000000e+00 : f32
      %32 = vector.broadcast %cst_15 : f32 to vector<8x256xf32>
      %33 = arith.select %31, %12, %32 : vector<8x256xi1>, vector<8x256xf32>
      %34 = vector.shape_cast %33 : vector<8x256xf32> to vector<1x8x256xf32>
      %cst_16 = arith.constant dense<0.000000e+00> : vector<1xf32>
      %35 = vector.multi_reduction <add>, %34, %cst_16 [1, 2] : vector<1x8x256xf32> to vector<1xf32>
      %36 = vector.shape_cast %35 : vector<1xf32> to vector<1x1x1xf32>
      %37 = vector.extract %36[0, 0, 0] : f32 from vector<1x1x1xf32>
      %38 = vector.shape_cast %12 : vector<8x256xf32> to vector<1x8x256xf32>
      %cst_17 = arith.constant dense<0.000000e+00> : vector<1xf32>
      %39 = vector.multi_reduction <add>, %38, %cst_17 [1, 2] : vector<1x8x256xf32> to vector<1xf32>
      %40 = vector.shape_cast %39 : vector<1xf32> to vector<1x1x1xf32>
      %41 = vector.extract %40[0, 0, 0] : f32 from vector<1x1x1xf32>
      %cst_18 = arith.constant 3.000000e+00 : f32
      %42 = arith.mulf %cst_18, %37 : f32
      %43 = arith.addf %41, %42 : f32
      %44 = vector.broadcast %43 : f32 to vector<1x8x128xf32>
      %c0_19 = arith.constant 0 : index
      %c0_20 = arith.constant 0 : index
      %c0_21 = arith.constant 0 : index
      %45 = vector.load %arg3[%c0_19, %c0_20, %c0_21] : memref<1x8x128xf32, #tpu.memory_space<vmem>>, vector<1x8x128xf32>
      tpu.vector_store %arg3[%c0_19, %c0_20, %c0_21], %44 {strides = array<i32>} : memref<1x8x128xf32, #tpu.memory_space<vmem>>, vector<1x8x128xf32>,
    } else {
    }
    return
  }
  func.func @transform_0(%arg0: i32, %arg1: i32) -> (i32, i32) {
    %c1_i32 = arith.constant 1 : i32
    %0 = arith.muli %arg0, %c1_i32 : i32
    %1 = arith.addi %0, %arg1 : i32
    %c0_i32 = arith.constant 0 : i32
    %c0_i32_0 = arith.constant 0 : i32
    return %1, %c0_i32 : i32, i32
  }
  func.func @transform_1(%arg0: i32, %arg1: i32) -> (i32, i32, i32) {
    %c0_i32 = arith.constant 0 : i32
    %c0_i32_0 = arith.constant 0 : i32
    %c0_i32_1 = arith.constant 0 : i32
    return %arg0, %c0_i32, %c0_i32_0 : i32, i32, i32
  }
}

</mosaic_0001>

<bundles_post_ra>
// kernel: tpu_custom_call.1
= control target key start
LH: loop header
LB: loop body
LE: loop exit
PB: predicated region body
PF: predicated region fallthrough
CT: control target
= control target key end

     0   :  { %6 = vsyncpa [#allocation4], 0  ;;  %s193_s0 = inlined_call_operand.hbm [shape: f32[8,256], index: 0, kind: input, shape index: {}]   ;;  %s194_s1 = inlined_call_operand.hbm [shape: f32[1,8,128], index: 1, kind: output, shape index: {}]  }
   0x1   :  { %7 = vsyncpa [#allocation5], 0  ;;  %s157_s6 = smov [#allocation3]   ;;  %s109_s10 = scalar_lea.hbm %s193_s0, 256 }
   0x2   :  { %s18_s7 = sshll.u32 %s157_s6, 4  ;;  %p110_p0 = scmp.ne.s32.totalorder %s193_s0, %s109_s10  ;;  %s19_s7 = int_to_ptr.vmem [resolvable:$true] %s18_s7 }
   0x3   :  { %p113_p1 = scmp.lt.u32.totalorder %s109_s10, %s193_s0 }
   0x5   :  { %p115_p2 = pnand %p113_p1, %p110_p0 }
   0x7   :  { %118 = shalt.err (!%p115_p2)
}
   0x8   :  { %s119_s15 = scalar_lea.vmem %s19_s7, 256  ;;  %p124_p4 = scmp.lt.s32.totalorder %s19_s7, %s19_s7 }
   0x9   :  { %p120_p3 = scmp.ne.s32.totalorder %s19_s7, %s119_s15  ;;  %p125_p5 = scmp.lt.s32.totalorder %s119_s15, %s119_s15 }
   0xb   :  { %p126_p6 = por %p125_p5, %p124_p4 }
   0xd   :  { %p127_p7 = pnand %p126_p6, %p120_p3 }
   0xf   :  { %130 = shalt.err (!%p127_p7)
}
  0x10   :  { %21 = dma.hbm_to_vmem [thread:$0]  %s193_s0, 256, %s19_s7, [#allocation4]  }
  0x11   :  { %153 = dma.done.wait [#allocation4], 256  }
  0x12   :  { %154 = vsyncadd [#allocation4], 4294967040  ;;  %v47_v0 = vlaneseq  ;;  %v32_v3 = vld [vmem:[#allocation3] sm:$0xff]  ;;  %v33_v4 = vld [vmem:[#allocation3 + $0x8] sm:$0xff]  ;;  %s158_s19 = smov [#allocation6]  }
  0x13   :  { %v74_v8 = vadd.f32 %v33_v4, %v32_v3  ;;  %s94_s20 = sshll.u32 %s158_s19, 4  ;;  %s95_s20 = int_to_ptr.vmem [resolvable:$true] %s94_s20 }
  0x14   :  { %v48_v1 = vshrl.u32 %v47_v0, 7  ;;  %s131_s23 = scalar_lea.vmem %s95_s20, 128  ;;  %p136_p9 = scmp.lt.s32.totalorder %s95_s20, %s95_s20 }
  0x15   :  { %p132_p8 = scmp.ne.s32.totalorder %s95_s20, %s131_s23  ;;  %p137_p10 = scmp.lt.s32.totalorder %s131_s23, %s131_s23 }
  0x16   :  { %v53_v2 = vand.u32 1, %v48_v1 }
  0x17   :  { %p138_p11 = por %p137_p10, %p136_p9 }
  0x18   :  { %vm61_vm0 = vcmp.eq.s32.totalorder %v53_v2, 1 }
  0x19   :  { %v62_v5 = vsel %vm61_vm0, %v32_v3, 0.0  ;;  %v63_v6 = vsel %vm61_vm0, %v33_v4, 0.0  ;;  %p139_p12 = pnand %p138_p11, %p132_p8 }
  0x1a   :  { %v64_v7 = vadd.f32 %v63_v6, %v62_v5 }
  0x1c   :  { %65 = vadd.xlane.f32.xlu0 %v64_v7 }
  0x20   :  { %75 = vadd.xlane.f32.xlu0 %v74_v8 }
  0xa9   :  { %v66_v9 = vpop.xlane.xlu0 %65 }
  0xaa   :  { %v67_v10 = vrot.slane %v66_v9, 4 }
  0xac   :  { %v68_v11 = vadd.f32 %v67_v10, %v66_v9 }
  0xad   :  { %v76_v12 = vpop.xlane.xlu0 %75 }
  0xae   :  { %v69_v13 = vrot.slane %v68_v11, 2  ;;  %v77_v14 = vrot.slane %v76_v12, 4 }
  0xb0   :  { %v78_v15 = vadd.f32 %v77_v14, %v76_v12  ;;  %v70_v16 = vadd.f32 %v69_v13, %v68_v11 }
  0xb2   :  { %v79_v17 = vrot.slane %v78_v15, 2  ;;  %v71_v18 = vrot.slane %v70_v16, 1 }
  0xb4   :  { %v80_v19 = vadd.f32 %v79_v17, %v78_v15  ;;  %v72_v20 = vadd.f32 %v71_v18, %v70_v16 }
  0xb6   :  { %103 = vpush %v72_v20  ;;  %v81_v21 = vrot.slane %v80_v19, 1 }
  0xb8   :  { %v82_v22 = vadd.f32 %v81_v21, %v80_v19 }
  0xba   :  { %105 = vpush %v82_v22 }
  0xe7   :  { %s104_s0 = spop %103 }
  0xe8   :  { %s84_s18 = smul.f32 3.0, %s104_s0 }
  0xeb   :  { %s106_s21 = spop %105 }
  0xec   :  { %s85_s22 = sadd.f32 %s106_s21, %s84_s18 }
  0xee   :  { %v86_v23 = vstv %s85_s22 }
  0xef   :  { %87 = vst [vmem:[#allocation6] sm:$0xff] %v86_v23 }
  0xf0   :  { %142 = shalt.err (!%p139_p12)
}
  0xf1   :  { %s143_s26 = scalar_lea.hbm %s194_s1, 128 }
  0xf2   :  { %p144_p13 = scmp.ne.s32.totalorder %s194_s1, %s143_s26  ;;  %p147_p0 = scmp.lt.u32.totalorder %s143_s26, %s194_s1 }
  0xf4   :  { %p149_p1 = pnand %p147_p0, %p144_p13 }
  0xf6   :  { %152 = shalt.err (!%p149_p1)
}
  0xf7   :  { %97 = dma.vmem_to_hbm [thread:$0]  %s95_s20, 128, %s194_s1, [#allocation5]  }
  0xf8   :  { %155 = dma.done.wait [#allocation5], 128  }
  0xf9   :  { %156 = vsyncadd [#allocation5], 4294967168 }
  0xfa   :  { %101 = vsyncpa [#allocation4], 1 }
  0xfb   :  { %102 = vsyncpa [#allocation5], 1 }

</bundles_post_ra>
